<compile_context>
chip_gen: v6e
topology: v6e:2x2x1
jax: 0.10.0
libtpu: 0.0.40
codegen_flags: <defaults>
</compile_context>

<pallas_src>
import functools

import jax
import jax.numpy as jnp
from jax.experimental import pallas as pl
from jax.experimental.pallas import tpu as pltpu

_LANE = 128          # vreg lane width
_MAX_TS = 65536      # absolute lane-tile cap (32-64K is the sweet spot at small C)
_MIN_GRID_STEPS = 8  # give v7x's 2 TensorCores scheduling slack
_BF16_MIN_C = 256    # cast to bf16 (f32 accumulate) only for deep GLOW levels


def _round_up(x, m):
    return (x + m - 1) // m * m


@functools.lru_cache(maxsize=None)
def _vmem_budgets():
    """(tile-buffer budget, scoped vmem limit) in bytes, per TPU generation."""
    try:
        cap = pltpu.get_tpu_info().vmem_capacity_bytes
    except Exception:
        cap = 64 * 1024 * 1024  # conservative fallback: v7x per-TC VMEM
    if cap >= 128 * 1024 * 1024:          # v5e / v6e: 128 MiB physical
        return 32 * 1024 * 1024, 64 * 1024 * 1024
    else:                                  # v7x: 64 MiB per TensorCore
        return 20 * 1024 * 1024, 48 * 1024 * 1024


def _invconv_kernel(w_ref, x_ref, z_ref):
    # w_ref: (C, C) channel-mixing weight; constant index_map -> DMA'd once and
    #        kept resident across the whole grid.
    # x_ref / z_ref: (C, TS) lane-dense spatial tile of one sample.
    # Memory-bound kernel: at GLOW channel counts the MXU pass (~TS/256 vmatmul
    # pushes) sits far below the tile's DMA time, so jnp.dot is kept; the
    # VPU broadcast-FMA fallback suggested for C <= 16 is not needed.
    z_ref[...] = jnp.dot(
        w_ref[...], x_ref[...], preferred_element_type=jnp.float32
    ).astype(z_ref.dtype)


@functools.partial(jax.jit, static_argnames=("reverse",))
def invconv_forward(x, sldj, weight, reverse=False):
    """Pallas implementation of InvConv.forward.

    Args:
      x:      (N, C, H, W) float32   (NCHW, matching the PyTorch module)
      sldj:   (N,)         float32
      weight: (C, C)       float32
      reverse: bool

    Returns:
      (z, sldj_out) with z of shape (N, C, H, W).
    """
    N, C, H, W = x.shape
    S = H * W

    # ---- log-det-Jacobian update (plain-JAX scalar glue) ---------------------
    ldj = jnp.linalg.slogdet(weight)[1] * (H * W)
    if reverse:
        # TODO(synk): TPU has no native f64; the PyTorch module's .double()
        # inverse is approximated with an f32 LU-based inverse here.
        w_use = jnp.linalg.inv(weight)
        sldj_out = sldj - ldj
    else:
        w_use = weight
        sldj_out = sldj + ldj

    # ---- inputs: free (N, C, S) view, optional bf16 for large-C layers ------
    x_in = x.reshape(N, C, S)             # contiguous NCHW -> free view, no copy
    w_in = w_use
    if C >= _BF16_MIN_C:
        x_in = x_in.astype(jnp.bfloat16)  # halves the binding HBM traffic
        w_in = w_in.astype(jnp.bfloat16)

    x_bytes = x_in.dtype.itemsize
    z_bytes = x.dtype.itemsize
    w_bytes = w_in.dtype.itemsize

    # ---- spatial tile size under a per-generation VMEM budget ----------------
    tile_budget, vmem_limit = _vmem_budgets()
    # Reserve the (double-buffered) weight residency out of the budget.
    tile_budget = max(2 * 1024 * 1024, tile_budget - 2 * C * C * w_bytes)
    # Two pipeline buffers each for the x tile and the z tile.
    max_ts = tile_budget // (2 * C * (x_bytes + z_bytes))
    max_ts = max(_LANE, max_ts // _LANE * _LANE)
    ts_cap = min(_MAX_TS, max_ts)

    if S % _LANE == 0:
        TS = min(ts_cap, S)
    elif S <= ts_cap:
        TS = S          # full-dim block: legal even when S is not 128-aligned
    else:
        TS = ts_cap     # 128-multiple block; ragged last tile is masked

    # Expose enough parallel grid steps for v7x's two TensorCores.
    while TS > _LANE and N * pl.cdiv(S, TS) < _MIN_GRID_STEPS:
        TS = max(_LANE, (TS // 2) // _LANE * _LANE)

    grid = (N, pl.cdiv(S, TS))

    cost = pl.CostEstimate(
        flops=2 * C * C * N * S,
        transcendentals=0,
        bytes_accessed=C * N * S * (x_bytes + z_bytes) + C * C * w_bytes,
    )

    z3 = pl.pallas_call(
        _invconv_kernel,
        out_shape=jax.ShapeDtypeStruct((N, C, S), x.dtype),
        grid_spec=pltpu.PrefetchScalarGridSpec(
            num_scalar_prefetch=0,
            grid=grid,
            in_specs=[
                # Constant index_map -> weight fetched once, never re-DMA'd.
                # (pl.Buffered(1) would also drop its dead second buffer, but
                #  the saving is tiny at GLOW channel counts.)
                pl.BlockSpec((C, C), lambda n, t: (0, 0)),
                pl.BlockSpec((pl.Squeezed(), C, TS), lambda n, t: (n, 0, t)),
            ],
            out_specs=pl.BlockSpec((pl.Squeezed(), C, TS), lambda n, t: (n, 0, t)),
        ),
        compiler_params=pltpu.CompilerParams(
            dimension_semantics=("parallel", "parallel"),
            vmem_limit_bytes=vmem_limit,
        ),
        cost_estimate=cost,
    )(w_in, x_in)

    return z3.reshape(N, C, H, W), sldj_out


def _reference(x, sldj, weight, reverse=False):
    """Pure-JAX reference matching the PyTorch semantics."""
    H, W = x.shape[2], x.shape[3]
    ldj = jnp.linalg.slogdet(weight)[1] * H * W
    if reverse:
        w_use = jnp.linalg.inv(weight)
        sldj_out = sldj - ldj
    else:
        w_use = weight
        sldj_out = sldj + ldj
    z = jnp.einsum("oi,nihw->nohw", w_use, x)
    return z, sldj_out


if __name__ == "__main__":
    # Shapes: batch=2, channels=4, spatial=16x16.
    N, C, H, W = 2, 4, 16, 16

    key = jax.random.PRNGKey(0)
    k_w, k_x, k_s = jax.random.split(key, 3)

    # Deterministic orthogonal weight init (mirrors np.linalg.qr(randn)[0]).
    w_init = jax.random.normal(k_w, (C, C), dtype=jnp.float32)
    weight = jnp.linalg.qr(w_init)[0].astype(jnp.float32)

    x = jax.random.normal(k_x, (N, C, H, W), dtype=jnp.float32)
    sldj = jax.random.normal(k_s, (N,), dtype=jnp.float32)

    # Forward path.
    z, sldj_out = invconv_forward(x, sldj, weight, reverse=False)
    jax.block_until_ready((z, sldj_out))
    z_ref, sldj_ref = _reference(x, sldj, weight, reverse=False)

    assert z.shape == (N, C, H, W)
    assert sldj_out.shape == (N,)
    assert jnp.allclose(z, z_ref, atol=1e-5, rtol=1e-5)
    assert jnp.allclose(sldj_out, sldj_ref, atol=1e-5, rtol=1e-5)

    # Reverse path (uses the f32 inverse in both kernel and reference).
    z_r, sldj_r = invconv_forward(x, sldj, weight, reverse=True)
    jax.block_until_ready((z_r, sldj_r))
    z_r_ref, sldj_r_ref = _reference(x, sldj, weight, reverse=True)
    assert jnp.allclose(z_r, z_r_ref, atol=1e-4, rtol=1e-4)
    assert jnp.allclose(sldj_r, sldj_r_ref, atol=1e-5, rtol=1e-5)

    print("KERNEL_OK")
</pallas_src>

<mosaic_0001>
module attributes {stable_mosaic.version = 11 : i64} {
  func.func @_invconv_kernel(%arg0: i32, %arg1: i32, %arg2: memref<4x4xf32, #tpu.memory_space<vmem>>, %arg3: memref<1x4x128xf32, #tpu.memory_space<vmem>>, %arg4: memref<1x4x128xf32, #tpu.memory_space<vmem>>) attributes {dimension_semantics = [#tpu.dimension_semantics<parallel>, #tpu.dimension_semantics<parallel>], iteration_bounds = array<i64: 2, 2>, scalar_prefetch = 0 : i64, scratch_operands = 0 : i64, tpu.core_type = #tpu.core_type<tc>, window_params = [{pipeline_mode = #tpu.pipeline_mode<synchronous>, transform_indices = @transform_0, window_bounds = array<i64: 4, 4>}, {transform_indices = @transform_1, window_bounds = array<i64: 1, 4, 128>}, {transform_indices = @transform_2, window_bounds = array<i64: 1, 4, 128>}]} {
    %c0 = arith.constant 0 : index
    %c0_0 = arith.constant 0 : index
    %0 = vector.load %arg2[%c0, %c0_0] : memref<4x4xf32, #tpu.memory_space<vmem>>, vector<4x4xf32>
    %c0_1 = arith.constant 0 : index
    %c0_2 = arith.constant 0 : index
    %c0_3 = arith.constant 0 : index
    %1 = vector.load %arg3[%c0_1, %c0_2, %c0_3] : memref<1x4x128xf32, #tpu.memory_space<vmem>>, vector<1x4x128xf32>
    %2 = vector.shape_cast %1 : vector<1x4x128xf32> to vector<4x128xf32>
    %cst = arith.constant dense<0.000000e+00> : vector<4x128xf32>
    %3 = tpu.matmul %0, %2, %cst {dimension_numbers = #tpu.dot_dimension_numbers<[1], [0], [0], [1], [0, 0, 1, 1], [], []>} : vector<4x4xf32>, vector<4x128xf32>, vector<4x128xf32> -> vector<4x128xf32>
    %c0_4 = arith.constant 0 : index
    %c0_5 = arith.constant 0 : index
    %c0_6 = arith.constant 0 : index
    %4 = vector.load %arg4[%c0_4, %c0_5, %c0_6] : memref<1x4x128xf32, #tpu.memory_space<vmem>>, vector<1x4x128xf32>
    %5 = vector.shape_cast %4 : vector<1x4x128xf32> to vector<4x128xf32>
    %6 = vector.shape_cast %3 : vector<4x128xf32> to vector<1x4x128xf32>
    tpu.vector_store %arg4[%c0_4, %c0_5, %c0_6], %6 {strides = array<i32>} : memref<1x4x128xf32, #tpu.memory_space<vmem>>, vector<1x4x128xf32>,
    return
  }
  func.func @transform_0(%arg0: i32, %arg1: i32) -> (i32, i32) {
    %c0_i32 = arith.constant 0 : i32
    %c0_i32_0 = arith.constant 0 : i32
    %c0_i32_1 = arith.constant 0 : i32
    return %c0_i32, %c0_i32_0 : i32, i32
  }
  func.func @transform_1(%arg0: i32, %arg1: i32) -> (i32, i32, i32) {
    %c0_i32 = arith.constant 0 : i32
    %c0_i32_0 = arith.constant 0 : i32
    return %arg0, %c0_i32, %arg1 : i32, i32, i32
  }
  func.func @transform_2(%arg0: i32, %arg1: i32) -> (i32, i32, i32) {
    %c0_i32 = arith.constant 0 : i32
    %c0_i32_0 = arith.constant 0 : i32
    return %arg0, %c0_i32, %arg1 : i32, i32, i32
  }
}

</mosaic_0001>

<bundles_post_ra>
// kernel: custom-call.2
= control target key start
LH: loop header
LB: loop body
LE: loop exit
PB: predicated region body
PF: predicated region fallthrough
CT: control target
= control target key end

     0   :  { %5 = vsyncpa [#allocation6], 0  ;;  %s549_s0 = inlined_call_operand.vmem [shape: f32[4,4], index: 0, kind: input, shape index: {}]   ;;  %s550_s1 = inlined_call_operand.vmem [shape: f32[4,4], index: 1, kind: output, shape index: {0}]   ;;  %s551_s2 = inlined_call_operand.hbm [shape: s32[4], index: 2, kind: output, shape index: {1}]   ;;  %s552_s3 = inlined_call_operand.hbm [shape: s32[4], index: 3, kind: output, shape index: {2}]  }
   0x1   :  { %6 = vsyncpa [#allocation9], 0  ;;  %v68_v0 = vld [vmem:[%s549_s0] sm:$0xf]  ;;  %v78_v1 = vlaneseq  ;;  %v478_v2 = vmov 0   ;;  %s508_s14 = smov 0  }
   0x2   :  { %69 = vst [vmem:[#allocation1] sm:$0xf] %v68_v0  ;;  %77 = vst [vmem:[#allocation4] sm:$0x1] %v478_v2 }
   0x3   :  { %v505_v3 = vshrl.u32 %v78_v1, 7 }
   0x5   :  { %82 = vst [vmem:[#allocation10] sm:$0xff] %v505_v3 }
   0x9   :  { %v73_v4 = vld [vmem:[#allocation1] sm:$0xf] }
   0xa   :  { %74 = vst [vmem:[#allocation0] sm:$0xf] %v73_v4 }
  0x11   :  { %v75_v5 = vld [vmem:[#allocation0] sm:$0xff] }
  0x12   :  { %76 = vst [vmem:[#allocation2] sm:$0xff] %v75_v5 }
  0x13 LB: > { %vm98_vm0 = vcmp.lt.s32.totalorder %v505_v3, 4  ;;  %v515_v8 = vstv %s476_s14  ;;  %s139_s0 = ssub.s32 128, %s476_s14  ;;  %v145_v38 = vand.u32 127, %v78_v1  ;;  %v148_v40 = vld [vmem:[#allocation4] ss:$0 sm:$0xff]  ;;  %s151_s15 = scalar_lea.vmem [#allocation2], %s476_s14  ;;  %s476_s14 = sphi %s508_s14, %s88_s14  }
  0x14   : > { %vm97_vm1 = vcmp.ge.s32.totalorder %v505_v3, %v515_v8  ;;  %s157_s17 = scalar_lea.vmem [#allocation10], %s476_s14  ;;  %vm177_vm15 = vcmp.gt.s32.totalorder %v505_v3, %v515_v8  ;;  %s88_s14 = sadd.s32 1, %s476_s14  }
  0x15   : > { %vm99_vm3 = vmand %vm97_vm1, %vm98_vm0  ;;  %vm169_vm12 = vcmp.gt.s32.totalorder %v145_v38, %v515_v8  ;;  %vm146_vm13 = vcmp.eq.s32.totalorder %v145_v38, %v515_v8  ;;  %v159_v42 = vld [vmem:[%s157_s17] ss:$0 sm:$0xff]  ;;  %p85_p0 = scmp.ge.s32.totalorder %s88_s14, 4  }
  0x16   : > { %vm181_vm1 = vmand %vm177_vm15, %vm146_vm13  ;;  %s479_s20 = smov (%p85_p0), [#allocation5]  }
  0x17   :  { %s329_s21 = sshll.u32 (%p85_p0), %s479_s20, 4  ;;  %s330_s21 = int_to_ptr.vmem [resolvable:$true] %s329_s21 }
  0x18   :  { %s426_s22 = scalar_lea.vmem (%p85_p0), %s330_s21, 16  ;;  %s430_s23 = scalar_lea.vmem (%p85_p0), %s330_s21, 32 }
  0x19   : > { %v93_v6 = vld [vmem:[#allocation2] sm:$0xff]  ;;  %v153_v41 = vld [vmem:[%s151_s15] ss:$0 sm:$0xff]  ;;  %p427_p1 = scmp.ne.s32.totalorder (%p85_p0), %s330_s21, %s426_s22  ;;  %p431_p2 = scmp.lt.s32.totalorder (%p85_p0), %s330_s21, %s330_s21 }
  0x1a   : > { %v94_v7 = vand.u32 2147483647, %v93_v6  ;;  %p432_p3 = scmp.lt.s32.totalorder (%p85_p0), %s430_s23, %s426_s22 }
  0x1c   : > { %vm407_vm2 = vcmp.gt.f32.partialorder %v94_v7, -inf  ;;  %p433_p4 = por (%p85_p0), %p432_p3, %p431_p2 }
  0x1d   : > { %vm101_vm4 = vmand %vm99_vm3, %vm407_vm2 }
  0x1e   : > { %v102_v9 = vsel %vm101_vm4, %v505_v3, %v515_v8  ;;  %v103_v10 = vsel %vm101_vm4, %v94_v7, -inf  ;;  %p434_p5 = pnand (%p85_p0), %p433_p4, %p427_p1 }
  0x1f   : > { %v104_v11 = vrot.slane %v103_v10, 1  ;;  %v105_v12 = vrot.slane %v102_v9, 1 }
  0x21   : > { %vm106_vm5 = vcmp.ge.f32.partialorder %v104_v11, %v103_v10  ;;  %v109_v13 = vrot.slane %v104_v11, 1  ;;  %v110_v14 = vrot.slane %v105_v12, 1 }
  0x22   : > { %v107_v15 = vsel %vm106_vm5, %v104_v11, %v103_v10  ;;  %v108_v16 = vsel %vm106_vm5, %v105_v12, %v102_v9 }
  0x23   : > { %vm111_vm6 = vcmp.ge.f32.partialorder %v109_v13, %v107_v15  ;;  %v114_v17 = vrot.slane %v109_v13, 1  ;;  %v115_v18 = vrot.slane %v110_v14, 1 }
  0x24   : > { %v112_v19 = vsel %vm111_vm6, %v109_v13, %v107_v15  ;;  %v113_v20 = vsel %vm111_vm6, %v110_v14, %v108_v16 }
  0x25   : > { %vm116_vm7 = vcmp.ge.f32.partialorder %v114_v17, %v112_v19  ;;  %v119_v21 = vrot.slane %v114_v17, 1  ;;  %v120_v22 = vrot.slane %v115_v18, 1 }
  0x26   : > { %v117_v23 = vsel %vm116_vm7, %v114_v17, %v112_v19  ;;  %v118_v24 = vsel %vm116_vm7, %v115_v18, %v113_v20 }
  0x27   : > { %vm121_vm8 = vcmp.ge.f32.partialorder %v119_v21, %v117_v23  ;;  %v124_v25 = vrot.slane %v119_v21, 1  ;;  %v125_v26 = vrot.slane %v120_v22, 1 }
  0x28   : > { %v122_v27 = vsel %vm121_vm8, %v119_v21, %v117_v23  ;;  %v123_v28 = vsel %vm121_vm8, %v120_v22, %v118_v24 }
  0x29   : > { %vm126_vm9 = vcmp.ge.f32.partialorder %v124_v25, %v122_v27  ;;  %v129_v29 = vrot.slane %v124_v25, 1  ;;  %v130_v30 = vrot.slane %v125_v26, 1 }
  0x2a   : > { %v127_v31 = vsel %vm126_vm9, %v124_v25, %v122_v27  ;;  %v128_v32 = vsel %vm126_vm9, %v125_v26, %v123_v28 }
  0x2b   : > { %vm131_vm10 = vcmp.ge.f32.partialorder %v129_v29, %v127_v31  ;;  %v134_v33 = vrot.slane %v129_v29, 1  ;;  %v135_v34 = vrot.slane %v130_v30, 1 }
  0x2c   : > { %v132_v35 = vsel %vm131_vm10, %v129_v29, %v127_v31  ;;  %v133_v36 = vsel %vm131_vm10, %v130_v30, %v128_v32 }
  0x2d   : > { %vm136_vm11 = vcmp.ge.f32.partialorder %v134_v33, %v132_v35 }
  0x2e   : > { %v138_v37 = vsel %vm136_vm11, %v135_v34, %v133_v36 }
  0x2f   : > { %140 = vrot.lane.b32.xlu0 %v138_v37, %s139_s0 }
  0xa1   : > { %v141_v39 = vpop.permute.xlu0 %140 }
  0xa2   : > { %411 = vpush %v141_v39 }
  0xd3   : > { %s412_s16 = spop %411 }
  0xd4   : > { %v147_v43 = vstv %s412_s16  ;;  %s152_s18 = scalar_lea.vmem [#allocation2], %s412_s16  ;;  %s158_s19 = scalar_lea.vmem [#allocation10], %s412_s16 }
  0xd5   : > { %v154_v44 = vld [vmem:[%s152_s18] ss:$0 sm:$0xff]  ;;  %v149_v46 = vsel %vm146_vm13, %v147_v43, %v148_v40 }
  0xd6   : > { %v160_v45 = vld [vmem:[%s158_s19] ss:$0 sm:$0xff]  ;;  %155 = vst [vmem:[%s152_s18] sm:$0x1] %v153_v41  ;;  %vm163_vm14 = vcmp.ne.f32.partialorder %v154_v44, 0.0  ;;  %150 = vst [vmem:[#allocation4] sm:$0x1] %v149_v46 }
  0xd7   : > { %161 = vst [vmem:[%s158_s19] sm:$0x1] %v159_v42  ;;  %156 = vst [vmem:[%s151_s15] sm:$0x1] %v154_v44  ;;  %v170_v53 = vsel %vm169_vm12, %v154_v44, 0.0 }
  0xd8   : > { %162 = vst [vmem:[%s157_s17] sm:$0x1] %v160_v45  ;;  %vm164_vm0 = vmand %vm146_vm13, %vm163_vm14 }
  0xd9   : > { %v165_v47 = vsel %vm164_vm0, %v154_v44, 1.0 }
  0xda   : > { %v178_v48 = vsel %vm177_vm15, %v165_v47, 1.0 }
  0xdb   : > { %424 = vrcp.f32 %v178_v48 }
  0xdd   :  { %v249_v59 = vld [vmem:[#allocation4] sm:$0x1] (%p85_p0) }
  0xde   : > { %v174_v50 = vld [vmem:[#allocation2] sm:$0xff]  ;;  %252 = vst [vmem:[#allocation5] sm:$0x1] (%p85_p0), %v249_v59 }
  0xdf   :  { %v188_v57 = vld [vmem:[#allocation10] sm:$0xff] (%p85_p0) }
  0xe8   : > { %v425_v49 = vpop.eup %424 }
  0xe9   : > { %v180_v51 = vmul.f32 %v425_v49, %v174_v50 }
  0xeb   : > { %v182_v52 = vsel %vm181_vm1, %v180_v51, 0.0 }
  0xec   : > { %183 = vadd.xlane.f32.xlu0 %v182_v52 }
 0x119   :  { %204 = vxpose.xlu0.b32.start.end [1/1] (short) (narrow) (%p85_p0), %v188_v57, 8 }
 0x175   : > { %v184_v54 = vpop.xlane.xlu0 %183 }
 0x176   : > { %v185_v55 = vmul.f32 %v184_v54, %v170_v53  ;;  %87 = sbr.rel (!%p85_p0) target bundleno = 19 (0x13), region = 134 }
 0x178   : > { %v186_v56 = vsub.f32 %v180_v51, %v185_v55 }
 0x17a   : > { %187 = vst [vmem:[#allocation2] sm:$0xff] %v186_v56 }
 0x181   :  { %v241_v58 = vld [vmem:[#allocation2] sm:$0xf] }
 0x182   :  { %244 = vst [vmem:[#allocation3] sm:$0xf] %v241_v58 }
 0x183   :  { %437 = shalt.err (!%p434_p5)
}
 0x184   :  { %332 = dma.vmem_to_hbm [thread:$0]  %s330_s21, 16, %s551_s2, [#allocation6]  }
 0x185   :  { %s480_s28 = smov [#allocation8]  }
 0x186   :  { %s338_s29 = sshll.u32 %s480_s28, 4  ;;  %s339_s29 = int_to_ptr.vmem [resolvable:$true] %s338_s29 }
 0x187   :  { %s446_s30 = scalar_lea.vmem %s339_s29, 16  ;;  %s450_s4 = scalar_lea.vmem %s339_s29, 32 }
 0x188   :  { %p447_p6 = scmp.ne.s32.totalorder %s339_s29, %s446_s30  ;;  %p451_p7 = scmp.lt.s32.totalorder %s339_s29, %s339_s29 }
 0x189   :  { %v322_v60 = vld [vmem:[#allocation3] sm:$0xf]  ;;  %p452_p8 = scmp.lt.s32.totalorder %s450_s4, %s446_s30 }
 0x18a   :  { %323 = vst [vmem:[%s550_s1] sm:$0xf] %v322_v60 }
 0x18b   :  { %p453_p9 = por %p452_p8, %p451_p7 }
 0x18d   :  { %p454_p10 = pnand %p453_p9, %p447_p6 }
 0x195   :  { %v220_v61 = vpop.trf.xlu0 }
 0x196   :  { %236 = vst [vmem:[#allocation7] sm:$0x1] %v220_v61 }
 0x19d   :  { %v257_v62 = vld [vmem:[#allocation7] sm:$0x1] }
 0x19e   :  { %260 = vst [vmem:[#allocation8] sm:$0x1] %v257_v62 }
 0x19f   :  { %457 = shalt.err (!%p454_p10)
}
 0x1a0   :  { %341 = dma.vmem_to_hbm [thread:$0]  %s339_s29, 16, %s552_s3, [#allocation9]  }
 0x1a1   :  { %470 = dma.done.wait [#allocation6], 16  }
 0x1a2   :  { %471 = vsyncadd [#allocation6], 4294967280 }
 0x1a3   :  { %472 = dma.done.wait [#allocation9], 16  }
 0x1a4   :  { %473 = vsyncadd [#allocation9], 4294967280 }
 0x1a5   :  { %348 = vsyncpa [#allocation6], 1 }
 0x1a6   :  { %349 = vsyncpa [#allocation9], 1 }

// kernel: invconv_forward.1
= control target key start
LH: loop header
LB: loop body
LE: loop exit
PB: predicated region body
PF: predicated region fallthrough
CT: control target
= control target key end

     0   :  { %s461_s9 = smov 0   ;;  %s463_s10 = smov 0   ;;  %s515_s0 = inlined_call_operand.vmem [shape: f32[4,4], index: 0, kind: input, shape index: {}]   ;;  %s516_s1 = inlined_call_operand.vmem [shape: f32[2,4,256], index: 1, kind: input, shape index: {}]   ;;  %s517_s2 = inlined_call_operand.vmem [shape: f32[2,4,256], index: 2, kind: output, shape index: {}]  }
   0x1   :  { %s465_s11 = smov 0   ;;  %s467_s12 = smov 0  }
   0x2   :  { %s469_s13 = smov 0  }
   0x3 LB: > { %s21_s14 = sadd.s32 1, %s434_s11  ;;  %s24_s15 = sadd.s32 1, %s438_s12  ;;  %s442_s13 = sphi %s469_s13, %s12_s13   ;;  %s438_s12 = sphi %s467_s12, %s521_s12   ;;  %s434_s11 = sphi %s465_s11, %s520_s11   ;;  %s430_s10 = sphi %s463_s10, %s519_s10   ;;  %s426_s9 = sphi %s461_s9, %s518_s9  }
   0x4   : > { %p22_p0 = scmp.ge.s32.totalorder %s21_s14, 2  ;;  %p346_p1 = scmp.ge.s32.totalorder %s442_s13, 1 }
   0x5   : > { %p131_p2 = scmp.lt.s32.totalorder %s442_s13, 5 }
   0x6   : > { %s523_s14 = smov (%p22_p0, %s21_s14), 0  ;;  %s525_s15 = smov (!%p22_p0, %s24_s15), %s438_s12 }
   0x7   : > { %p132_p3 = pnand %p346_p1, %p131_p2  ;;  %p26_p4 = scmp.ge.s32.totalorder %s525_s15, 2 }
   0x8   : > { %p159_p5 = scmp.lt.s32.totalorder (!%p132_p3), %s430_s10, 1  ;;  %p161_p6 = scmp.lt.s32.totalorder (!%p132_p3), %s426_s9, 1 }
   0x9   : > { %s527_s15 = smov (%p26_p4, %s525_s15), 0  ;;  %135 = sbr.rel (%p132_p3) target bundleno = 216 (0xd8), region = 28 }
   0xe   : > { %v444_v0 = vmov 0.0   ;;  %vm445_vm0 = vmmov 0   ;;  %s529_s10 = smov (!%p159_p5, %s430_s10), 1  ;;  %s531_s9 = smov (!%p161_p6, %s426_s9), 1  ;;  %vm181_vm1 = vcmask 1043456   ;;  %vm177_vm2 = vcmask 31744  }
   0xf   : > { %357 = vmatprep.subr.mxu0 %v444_v0  ;;  %359 = vmatprep.mubr.msk.f32.mxu0 %vm445_vm0, %v444_v0  ;;  %s347_s16 = sshll.u32 %s529_s10, 1  ;;  %v175_v1 = vld [vmem:[%s515_s0] sm:$0xf] }
  0x10   : > { %s164_s17 = sadd.s32 %s347_s16, %s531_s9 }
  0x11   : > { %s348_s18 = sshll.u32 %s164_s17, 2 }
  0x12   : > { %s166_s21 = scalar_lea.vmem %s516_s1, %s348_s18  ;;  %s174_s26 = scalar_lea.vmem %s517_s2, %s348_s18 }
  0x13   : > { %v176_v2 = vld [vmem:[%s166_s21] sm:$0xf] }
  0x14   : > { %358 = vmatpush3.msk.msra.mxu0 %vm181_vm1, %v176_v2 }
  0x15   : > { %360 = vmatmul.mubr.msk.f32.vlgmr.msra.gmra.mxu0 %vm177_vm2, %v175_v1 }
  0xd5   : > { %v251_v3 = vpop.f32.mrf.mxu0 }
  0xd6   : > { %255 = vst [vmem:[%s174_s26] sm:$0xf] %v251_v3 }
  0xd7   : > { %v361_v4 = vpop.f32.mrf.mxu0 }
  0xd8 PF: > { %s12_s13 = sadd.s32 1, %s442_s13   ;;  %s518_s9 = smov %s434_s11 }
  0xd9   : > { %p9_p7 = scmp.ge.s32.totalorder %s12_s13, 6   ;;  %s519_s10 = smov %s438_s12 }
  0xda   : > { %s520_s11 = smov %s523_s14  ;;  %s521_s12 = smov %s527_s15 }
  0xdb   :  { %11 = sbr.rel (!%p9_p7) target bundleno = 3 (0x3), region = 58 }

</bundles_post_ra>
